<compile_context>
chip_gen: v6e
topology: v6e:2x2x1
jax: 0.10.0
libtpu: 0.0.40
codegen_flags: <defaults>
</compile_context>

<pallas_src>
import jax
import jax.numpy as jnp
from jax import lax
from jax.experimental import pallas as pl
from jax.experimental.pallas import tpu as pltpu


def _round_up(x: int, m: int) -> int:
    return ((x + m - 1) // m) * m


def _vmem_capacity_bytes() -> int:
    """Physical VMEM of the local TPU; conservative 64 MiB fallback."""
    try:
        cap = int(pltpu.get_tpu_info().vmem_capacity_bytes)
        if cap > 0:
            return cap
    except Exception:
        pass
    return 64 << 20  # v7x-sized fallback; safe on every generation


def _vmem_usage(tm: int, tn: int, tk: int, in_item: int, out_item: int) -> int:
    """Estimated VMEM footprint (double-buffered inputs/outputs + f32 acc)."""
    return (
        2 * tm * tk * in_item      # x tiles (double buffered)
        + 2 * tn * tk * in_item    # W tiles (double buffered)
        + 2 * tn * in_item         # bias tiles
        + 2 * tm * tn * out_item   # output tiles (double buffered)
        + tm * tn * 4              # f32 accumulator scratch
    )


def _select_tiles(M, N, K, in_item, out_item, vmem_budget, sublane):
    m_al = _round_up(M, sublane)
    n_al = _round_up(N, 128)
    k_al = _round_up(K, 128)

    def fits(a, b, c):
        return _vmem_usage(a, b, c, in_item, out_item) <= vmem_budget

    # K tile: biggest 128-multiple chunk up to 1024 (or whole K if smaller).
    tk = min(1024, k_al)

    # For modest per-expert batches keep the whole activation block resident:
    # each weight tile is then streamed from HBM exactly once.
    tm = m_al if m_al <= 2048 else 512
    tn = min(512, n_al)

    # Grow tn, then tm (256-friendly doublings) while VMEM budget allows —
    # each doubling halves the re-streaming of the opposite operand.
    while tn < n_al and tn < 2048 and fits(tm, min(2 * tn, n_al), tk):
        tn = min(2 * tn, n_al)
    while tm < m_al and tm < 2048 and fits(min(2 * tm, m_al), tn, tk):
        tm = min(2 * tm, m_al)

    # Shrink (largest dim first) until the configuration fits the budget.
    while not fits(tm, tn, tk):
        if tk > 128 and tk >= tn and tk >= tm:
            tk = _round_up(tk // 2, 128)
        elif tn > 128 and tn >= tm:
            tn = _round_up(tn // 2, 128)
        elif tm > sublane:
            tm = _round_up(tm // 2, sublane)
        elif tk > 128:
            tk = _round_up(tk // 2, 128)
        elif tn > 128:
            tn = _round_up(tn // 2, 128)
        else:
            break  # already at the minimum legal tile

    # Make sure the two "parallel" grid axes expose >= 2 iterations so both
    # v7x TensorCores get work.  Prefer splitting N (keeps W traffic minimal).
    if pl.cdiv(M, tm) * pl.cdiv(N, tn) < 2:
        if n_al > 128:
            tn = _round_up(pl.cdiv(N, 2), 128)
        elif m_al > sublane:
            tm = _round_up(pl.cdiv(M, 2), sublane)

    return tm, tn, tk


def _make_expert_kernel(K: int, tk: int, need_k_mask: bool):
    """Builds the kernel for one (tm, tn) output tile accumulated over K."""

    def kernel(x_ref, w_ref, b_ref, o_ref, acc_ref):
        k = pl.program_id(2)

        @pl.when(k == 0)
        def _():
            acc_ref[...] = jnp.zeros_like(acc_ref)

        x = x_ref[...]
        w = w_ref[...]
        if need_k_mask:
            # Last K block may extend past K; OOB VMEM contents are undefined,
            # so mask BOTH operands (0 * NaN would poison valid outputs).
            valid = K - k * tk
            colx = lax.broadcasted_iota(jnp.int32, x.shape, 1)
            colw = lax.broadcasted_iota(jnp.int32, w.shape, 1)
            x = jnp.where(colx < valid, x, jnp.zeros_like(x))
            w = jnp.where(colw < valid, w, jnp.zeros_like(w))

        # Contract x (tm, tk) with W (tn, tk) over their last axes -> (tm, tn);
        # W stays in PyTorch (out, in) layout (transposed-RHS MXU contraction).
        acc_ref[...] += lax.dot_general(
            x,
            w,
            dimension_numbers=(((1,), (1,)), ((), ())),
            preferred_element_type=jnp.float32,
        )

        @pl.when(k == pl.num_programs(2) - 1)
        def _():
            # Epilogue: bias add in f32, single cast to the output dtype.
            o_ref[...] = (
                acc_ref[...] + b_ref[...].astype(jnp.float32)
            ).astype(o_ref.dtype)

    return kernel


def expert_forward(x, weight, bias, *, vmem_budget_frac=0.65):
    """y = x @ weight.T + bias, matching torch.nn.Linear.

    x:      (batch, in_features)
    weight: (out_features, in_features)   -- PyTorch layout (never copied)
    bias:   (out_features,)
    """
    M, K = x.shape
    N, Kw = weight.shape
    assert K == Kw, "weight in_features must match x"
    assert bias.shape == (N,)

    in_item = x.dtype.itemsize
    out_item = x.dtype.itemsize
    # dtype-aware sublane granularity: 8 (f32), 16 (bf16), 32 (int8/fp8).
    sublane = (4 // max(in_item, 1)) * 8

    vmem_cap = _vmem_capacity_bytes()
    vmem_budget = int(vmem_cap * vmem_budget_frac)

    tm, tn, tk = _select_tiles(M, N, K, in_item, out_item, vmem_budget, sublane)

    grid = (pl.cdiv(M, tm), pl.cdiv(N, tn), pl.cdiv(K, tk))
    need_k_mask = (K % tk) != 0

    usage = _vmem_usage(tm, tn, tk, in_item, out_item)
    # Raise the scoped-VMEM limit above the 16/32 MiB defaults, leaving
    # headroom below physical capacity (critical on v7x's 64 MiB).
    vmem_limit = int(min(vmem_cap - (8 << 20), max(64 << 20, 2 * usage)))
    vmem_limit = max(vmem_limit, usage + (4 << 20))

    cost = pl.CostEstimate(
        flops=2 * M * N * K,
        transcendentals=0,
        bytes_accessed=(
            x.size * in_item
            + weight.size * in_item
            + bias.size * in_item
            + M * N * out_item
        ),
    )

    kernel = _make_expert_kernel(K, tk, need_k_mask)

    return pl.pallas_call(
        kernel,
        out_shape=jax.ShapeDtypeStruct((M, N), x.dtype),
        grid_spec=pltpu.PrefetchScalarGridSpec(
            num_scalar_prefetch=0,
            grid=grid,
            in_specs=[
                pl.BlockSpec((tm, tk), lambda i, j, k: (i, k)),   # x
                pl.BlockSpec((tn, tk), lambda i, j, k: (j, k)),   # W (out, in)
                pl.BlockSpec((1, tn), lambda i, j, k: (0, j)),    # bias
            ],
            out_specs=pl.BlockSpec((tm, tn), lambda i, j, k: (i, j)),
            scratch_shapes=[pltpu.VMEM((tm, tn), jnp.float32)],
        ),
        compiler_params=pltpu.CompilerParams(
            dimension_semantics=("parallel", "parallel", "arbitrary"),
            vmem_limit_bytes=vmem_limit,
        ),
        cost_estimate=cost,
    )(x, weight, bias.reshape(1, N))


if __name__ == "__main__":
    key = jax.random.PRNGKey(0)
    keys = jax.random.split(key, 9)

    # --- Small shapes consistent with Expert(input_size, output_size). ---
    batch, input_size, output_size = 8, 32, 16
    bound = 1.0 / (input_size ** 0.5)
    x = jax.random.normal(keys[0], (batch, input_size), dtype=jnp.float32)
    weight = jax.random.uniform(
        keys[1], (output_size, input_size), minval=-bound, maxval=bound,
        dtype=jnp.float32)
    bias = jax.random.uniform(
        keys[2], (output_size,), minval=-bound, maxval=bound,
        dtype=jnp.float32)

    y = jax.block_until_ready(expert_forward(x, weight, bias))
    y_ref = x @ weight.T + bias
    assert y.shape == (batch, output_size)
    assert jnp.allclose(y, y_ref, atol=1e-5, rtol=1e-5)

    # --- Non-aligned shapes: partial M/N edge tiles + masked K remainder. ---
    M2, K2, N2 = 300, 513, 200
    bound2 = 1.0 / (K2 ** 0.5)
    x2 = jax.random.normal(keys[3], (M2, K2), dtype=jnp.float32)
    w2 = jax.random.uniform(
        keys[4], (N2, K2), minval=-bound2, maxval=bound2, dtype=jnp.float32)
    b2 = jax.random.uniform(
        keys[5], (N2,), minval=-bound2, maxval=bound2, dtype=jnp.float32)

    y2 = jax.block_until_ready(expert_forward(x2, w2, b2))
    y2_ref = x2 @ w2.T + b2
    assert y2.shape == (M2, N2)
    assert jnp.allclose(y2, y2_ref, atol=1e-3, rtol=1e-3)

    # --- K > tk: exercises multi-step K accumulation + K-remainder mask. ---
    M3, K3, N3 = 64, 1300, 384
    bound3 = 1.0 / (K3 ** 0.5)
    x3 = jax.random.normal(keys[6], (M3, K3), dtype=jnp.float32)
    w3 = jax.random.uniform(
        keys[7], (N3, K3), minval=-bound3, maxval=bound3, dtype=jnp.float32)
    b3 = jax.random.uniform(
        keys[8], (N3,), minval=-bound3, maxval=bound3, dtype=jnp.float32)

    y3 = jax.block_until_ready(expert_forward(x3, w3, b3))
    y3_ref = x3 @ w3.T + b3
    assert y3.shape == (M3, N3)
    assert jnp.allclose(y3, y3_ref, atol=1e-3, rtol=1e-3)

    print("KERNEL_OK")
</pallas_src>

<mosaic_0001>
module attributes {stable_mosaic.version = 11 : i64} {
  func.func @kernel(%arg0: i32, %arg1: i32, %arg2: i32, %arg3: memref<8x128xf32, #tpu.memory_space<vmem>>, %arg4: memref<128x128xf32, #tpu.memory_space<vmem>>, %arg5: memref<1x128xf32, #tpu.memory_space<vmem>>, %arg6: memref<8x128xf32, #tpu.memory_space<vmem>>, %arg7: memref<8x128xf32, #tpu.memory_space<vmem>>) attributes {dimension_semantics = [#tpu.dimension_semantics<parallel>, #tpu.dimension_semantics<parallel>, #tpu.dimension_semantics<arbitrary>], iteration_bounds = array<i64: 1, 1, 1>, scalar_prefetch = 0 : i64, scratch_operands = 1 : i64, tpu.core_type = #tpu.core_type<tc>, window_params = [{transform_indices = @transform_0, window_bounds = array<i64: 8, 128>}, {transform_indices = @transform_1, window_bounds = array<i64: 128, 128>}, {transform_indices = @transform_2, window_bounds = array<i64: 1, 128>}, {transform_indices = @transform_3, window_bounds = array<i64: 8, 128>}]} {
    %c0_i32 = arith.constant 0 : i32
    %0 = arith.cmpi eq, %arg2, %c0_i32 : i32
    %1 = arith.extui %0 : i1 to i32
    %c0_i32_0 = arith.constant 0 : i32
    %2 = arith.cmpi ne, %1, %c0_i32_0 : i32
    scf.if %2 {
      %cst_12 = arith.constant 0.000000e+00 : f32
      %24 = vector.broadcast %cst_12 : f32 to vector<8x128xf32>
      %c0_13 = arith.constant 0 : index
      %c0_14 = arith.constant 0 : index
      %25 = vector.load %arg7[%c0_13, %c0_14] : memref<8x128xf32, #tpu.memory_space<vmem>>, vector<8x128xf32>
      tpu.vector_store %arg7[%c0_13, %c0_14], %24 {strides = array<i32>} : memref<8x128xf32, #tpu.memory_space<vmem>>, vector<8x128xf32>,
    } else {
    }
    %c0 = arith.constant 0 : index
    %c0_1 = arith.constant 0 : index
    %3 = vector.load %arg3[%c0, %c0_1] : memref<8x128xf32, #tpu.memory_space<vmem>>, vector<8x128xf32>
    %c0_2 = arith.constant 0 : index
    %c0_3 = arith.constant 0 : index
    %4 = vector.load %arg4[%c0_2, %c0_3] : memref<128x128xf32, #tpu.memory_space<vmem>>, vector<128x128xf32>
    %c128_i32 = arith.constant 128 : i32
    %5 = arith.muli %arg2, %c128_i32 : i32
    %c32_i32 = arith.constant 32 : i32
    %6 = arith.subi %c32_i32, %5 : i32
    %7 = tpu.iota {dimensions = array<i32: 1>} : vector<8x128xi32>
    %8 = tpu.iota {dimensions = array<i32: 1>} : vector<128x128xi32>
    %9 = vector.broadcast %6 : i32 to vector<8x128xi32>
    %10 = arith.cmpi slt, %7, %9 : vector<8x128xi32>
    %cst = arith.constant 0.000000e+00 : f32
    %11 = vector.broadcast %cst : f32 to vector<8x128xf32>
    %12 = arith.select %10, %3, %11 : vector<8x128xi1>, vector<8x128xf32>
    %13 = vector.broadcast %6 : i32 to vector<128x128xi32>
    %14 = arith.cmpi slt, %8, %13 : vector<128x128xi32>
    %cst_4 = arith.constant 0.000000e+00 : f32
    %15 = vector.broadcast %cst_4 : f32 to vector<128x128xf32>
    %16 = arith.select %14, %4, %15 : vector<128x128xi1>, vector<128x128xf32>
    %c0_5 = arith.constant 0 : index
    %c0_6 = arith.constant 0 : index
    %17 = vector.load %arg7[%c0_5, %c0_6] : memref<8x128xf32, #tpu.memory_space<vmem>>, vector<8x128xf32>
    %cst_7 = arith.constant dense<0.000000e+00> : vector<8x128xf32>
    %18 = tpu.matmul %12, %16, %cst_7 {dimension_numbers = #tpu.dot_dimension_numbers<[1], [1], [0], [0], [0, 0, 1, 0], [], []>} : vector<8x128xf32>, vector<128x128xf32>, vector<8x128xf32> -> vector<8x128xf32>
    %19 = arith.addf %17, %18 : vector<8x128xf32>
    %c0_8 = arith.constant 0 : index
    %c0_9 = arith.constant 0 : index
    %20 = vector.load %arg7[%c0_8, %c0_9] : memref<8x128xf32, #tpu.memory_space<vmem>>, vector<8x128xf32>
    tpu.vector_store %arg7[%c0_8, %c0_9], %19 {strides = array<i32>} : memref<8x128xf32, #tpu.memory_space<vmem>>, vector<8x128xf32>,
    %c0_i32_10 = arith.constant 0 : i32
    %21 = arith.cmpi eq, %arg2, %c0_i32_10 : i32
    %22 = arith.extui %21 : i1 to i32
    %c0_i32_11 = arith.constant 0 : i32
    %23 = arith.cmpi ne, %22, %c0_i32_11 : i32
    scf.if %23 {
      %c0_12 = arith.constant 0 : index
      %c0_13 = arith.constant 0 : index
      %24 = vector.load %arg7[%c0_12, %c0_13] : memref<8x128xf32, #tpu.memory_space<vmem>>, vector<8x128xf32>
      %c0_14 = arith.constant 0 : index
      %c0_15 = arith.constant 0 : index
      %25 = vector.load %arg5[%c0_14, %c0_15] : memref<1x128xf32, #tpu.memory_space<vmem>>, vector<1x128xf32>
      %26 = vector.broadcast %25 : vector<1x128xf32> to vector<8x128xf32>
      %27 = arith.addf %24, %26 : vector<8x128xf32>
      %c0_16 = arith.constant 0 : index
      %c0_17 = arith.constant 0 : index
      %28 = vector.load %arg6[%c0_16, %c0_17] : memref<8x128xf32, #tpu.memory_space<vmem>>, vector<8x128xf32>
      tpu.vector_store %arg6[%c0_16, %c0_17], %27 {strides = array<i32>} : memref<8x128xf32, #tpu.memory_space<vmem>>, vector<8x128xf32>,
    } else {
    }
    return
  }
  func.func @transform_0(%arg0: i32, %arg1: i32, %arg2: i32) -> (i32, i32) {
    %c0_i32 = arith.constant 0 : i32
    return %arg0, %arg2 : i32, i32
  }
  func.func @transform_1(%arg0: i32, %arg1: i32, %arg2: i32) -> (i32, i32) {
    %c0_i32 = arith.constant 0 : i32
    return %arg1, %arg2 : i32, i32
  }
  func.func @transform_2(%arg0: i32, %arg1: i32, %arg2: i32) -> (i32, i32) {
    %c0_i32 = arith.constant 0 : i32
    %c0_i32_0 = arith.constant 0 : i32
    return %c0_i32, %arg1 : i32, i32
  }
  func.func @transform_3(%arg0: i32, %arg1: i32, %arg2: i32) -> (i32, i32) {
    %c0_i32 = arith.constant 0 : i32
    return %arg0, %arg1 : i32, i32
  }
}

</mosaic_0001>

<bundles_post_ra>
// kernel: tpu_custom_call.1
= control target key start
LH: loop header
LB: loop body
LE: loop exit
PB: predicated region body
PF: predicated region fallthrough
CT: control target
= control target key end

     0   :  { %8 = vsyncpa [#allocation4], 0  ;;  %s387_s0 = inlined_call_operand.hbm [shape: f32[8,32], index: 0, kind: input, shape index: {}]   ;;  %s388_s1 = inlined_call_operand.hbm [shape: f32[16,32], index: 1, kind: input, shape index: {}]   ;;  %s389_s2 = inlined_call_operand.vmem [shape: f32[1,16], index: 2, kind: input, shape index: {}]   ;;  %s390_s3 = inlined_call_operand.hbm [shape: f32[8,16], index: 3, kind: output, shape index: {}]  }
   0x1   :  { %9 = vsyncpa [#allocation7], 0 }
   0x2   :  { %10 = vsyncpa [#allocation5], 0  ;;  %s331_s12 = smov [#allocation3]  }
   0x3   :  { %s17_s13 = sshll.u32 %s331_s12, 4  ;;  %s18_s13 = int_to_ptr.vmem [resolvable:$true] %s17_s13 }
   0x4   :  { %s273_s14 = scalar_lea.vmem %s18_s13, 128  ;;  %p278_p1 = scmp.lt.s32.totalorder %s18_s13, %s18_s13 }
   0x5   :  { %p274_p0 = scmp.ne.s32.totalorder %s18_s13, %s273_s14  ;;  %p279_p2 = scmp.lt.s32.totalorder %s273_s14, %s273_s14 }
   0x7   :  { %p280_p3 = por %p279_p2, %p278_p1 }
   0x9   :  { %p281_p4 = pnand %p280_p3, %p274_p0 }
   0xb   :  { %284 = shalt.err (!%p281_p4)
}
   0xc   :  { %20 = dma.hbm_to_vmem [thread:$0]  %s387_s0, 128, %s18_s13, [#allocation4]  }
   0xd   :  { %25 = vsyncadd [#allocation7], 1792  ;;  %s332_s17 = smov [#allocation6]  }
   0xe   :  { %s26_s18 = sshll.u32 %s332_s17, 4  ;;  %s27_s18 = int_to_ptr.vmem [resolvable:$true] %s26_s18 }
   0xf   :  { %s293_s19 = scalar_lea.vmem %s27_s18, 256  ;;  %s297_s20 = scalar_lea.vmem %s27_s18, 2048 }
  0x10   :  { %p294_p5 = scmp.ne.s32.totalorder %s27_s18, %s293_s19  ;;  %p298_p6 = scmp.lt.s32.totalorder %s27_s18, %s27_s18 }
  0x11   :  { %p299_p7 = scmp.lt.s32.totalorder %s297_s20, %s293_s19 }
  0x13   :  { %p300_p8 = por %p299_p7, %p298_p6 }
  0x15   :  { %p301_p9 = pnand %p300_p8, %p294_p5 }
  0x17   :  { %304 = shalt.err (!%p301_p9)
}
  0x18   :  { %s333_s21 = smov 128   ;;  %s334_s22 = smov 8  }
  0x19   :  { %32 = dma.hbm_to_vmem [thread:$0]  %s388_s1, 256, %s27_s18, [#allocation7], %s333_s21, %s333_s21, %s334_s22  }
  0x1a   :  { %325 = dma.done.wait [#allocation4], 128  }
  0x1b   :  { %326 = vsyncadd [#allocation4], 4294967168 }
  0x1c   :  { %327 = dma.done.wait [#allocation7], 2048  }
  0x1d   :  { %328 = vsyncadd [#allocation7], 4294965248  ;;  %v65_v0 = vlaneseq  ;;  %v335_v1 = vmov 0.0   ;;  %vm336_vm0 = vmmov 0   ;;  %v62_v3 = vld [vmem:[#allocation6 + $0x78] sm:$0xff]  ;;  %v61_v4 = vld [vmem:[#allocation6 + $0x70] sm:$0xff] }
  0x1e   :  { %223 = vmatprep.subr.mxu0 %v335_v1  ;;  %255 = vmatprep.mubr.msk.f32.mxu0 %vm336_vm0, %v335_v1  ;;  %v60_v5 = vld [vmem:[#allocation6 + $0x68] sm:$0xff]  ;;  %v59_v6 = vld [vmem:[#allocation6 + $0x60] sm:$0xff]  ;;  %v58_v7 = vld [vmem:[#allocation6 + $0x58] sm:$0xff]  ;;  %s337_s25 = smov [#allocation8]  }
  0x1f   :  { %v66_v2 = vand.u32 127, %v65_v0  ;;  %v57_v8 = vld [vmem:[#allocation6 + $0x50] sm:$0xff]  ;;  %v56_v9 = vld [vmem:[#allocation6 + $0x48] sm:$0xff]  ;;  %v55_v10 = vld [vmem:[#allocation6 + $0x40] sm:$0xff]  ;;  %s178_s26 = sshll.u32 %s337_s25, 4  ;;  %s179_s26 = int_to_ptr.vmem [resolvable:$true] %s178_s26 }
  0x20   :  { %v54_v11 = vld [vmem:[#allocation6 + $0x38] sm:$0xff]  ;;  %v53_v12 = vld [vmem:[#allocation6 + $0x30] sm:$0xff]  ;;  %v52_v13 = vld [vmem:[#allocation6 + $0x28] sm:$0xff]  ;;  %s305_s27 = scalar_lea.vmem %s179_s26, 128  ;;  %p310_p11 = scmp.lt.s32.totalorder %s179_s26, %s179_s26 }
  0x21   :  { %vm68_vm1 = vcmp.lt.s32.totalorder %v66_v2, 32  ;;  %v51_v14 = vld [vmem:[#allocation6 + $0x20] sm:$0xff]  ;;  %v50_v15 = vld [vmem:[#allocation6 + $0x18] sm:$0xff]  ;;  %v49_v16 = vld [vmem:[#allocation6 + $0x10] sm:$0xff]  ;;  %p306_p10 = scmp.ne.s32.totalorder %s179_s26, %s305_s27  ;;  %p311_p12 = scmp.lt.s32.totalorder %s305_s27, %s305_s27 }
  0x22   :  { %224 = vmatpush3.xpose.msk.msra.mxu0 %vm68_vm1, %v62_v3  ;;  %v48_v17 = vld [vmem:[#allocation6 + $0x8] sm:$0xff]  ;;  %v47_v18 = vld [vmem:[#allocation6] sm:$0xff]  ;;  %v46_v19 = vld [vmem:[#allocation3] sm:$0xff] }
  0x23   :  { %225 = vmatprep.subr.mxu0 %v335_v1  ;;  %v205_v20 = vld [vmem:[%s389_s2] ss:$0 sm:$0xff]  ;;  %p312_p13 = por %p311_p12, %p310_p11 }
  0x25   :  { %p313_p0 = pnand %p312_p13, %p306_p10 }
  0x26   :  { %226 = vmatpush3.xpose.msk.msra.mxu0 %vm68_vm1, %v61_v4 }
  0x27   :  { %227 = vmatprep.subr.mxu0 %v335_v1 }
  0x2a   :  { %228 = vmatpush3.xpose.msk.msra.mxu0 %vm68_vm1, %v60_v5 }
  0x2b   :  { %229 = vmatprep.subr.mxu0 %v335_v1 }
  0x2e   :  { %230 = vmatpush3.xpose.msk.msra.mxu0 %vm68_vm1, %v59_v6 }
  0x2f   :  { %231 = vmatprep.subr.mxu0 %v335_v1 }
  0x32   :  { %232 = vmatpush3.xpose.msk.msra.mxu0 %vm68_vm1, %v58_v7 }
  0x33   :  { %233 = vmatprep.subr.mxu0 %v335_v1 }
  0x36   :  { %234 = vmatpush3.xpose.msk.msra.mxu0 %vm68_vm1, %v57_v8 }
  0x37   :  { %235 = vmatprep.subr.mxu0 %v335_v1 }
  0x3a   :  { %236 = vmatpush3.xpose.msk.msra.mxu0 %vm68_vm1, %v56_v9 }
  0x3b   :  { %237 = vmatprep.subr.mxu0 %v335_v1 }
  0x3e   :  { %238 = vmatpush3.xpose.msk.msra.mxu0 %vm68_vm1, %v55_v10 }
  0x3f   :  { %239 = vmatprep.subr.mxu0 %v335_v1 }
  0x42   :  { %240 = vmatpush3.xpose.msk.msra.mxu0 %vm68_vm1, %v54_v11 }
  0x43   :  { %241 = vmatprep.subr.mxu0 %v335_v1 }
  0x46   :  { %242 = vmatpush3.xpose.msk.msra.mxu0 %vm68_vm1, %v53_v12 }
  0x47   :  { %243 = vmatprep.subr.mxu0 %v335_v1 }
  0x4a   :  { %244 = vmatpush3.xpose.msk.msra.mxu0 %vm68_vm1, %v52_v13 }
  0x4b   :  { %245 = vmatprep.subr.mxu0 %v335_v1 }
  0x4e   :  { %246 = vmatpush3.xpose.msk.msra.mxu0 %vm68_vm1, %v51_v14 }
  0x4f   :  { %247 = vmatprep.subr.mxu0 %v335_v1 }
  0x52   :  { %248 = vmatpush3.xpose.msk.msra.mxu0 %vm68_vm1, %v50_v15 }
  0x53   :  { %249 = vmatprep.subr.mxu0 %v335_v1 }
  0x56   :  { %250 = vmatpush3.xpose.msk.msra.mxu0 %vm68_vm1, %v49_v16 }
  0x57   :  { %251 = vmatprep.subr.mxu0 %v335_v1 }
  0x5a   :  { %252 = vmatpush3.xpose.msk.msra.mxu0 %vm68_vm1, %v48_v17 }
  0x5b   :  { %253 = vmatprep.subr.mxu0 %v335_v1 }
  0x5e   :  { %254 = vmatpush3.xpose.msk.msra.mxu0 %vm68_vm1, %v47_v18 }
  0x61   :  { %256 = vmatmul.mubr.msk.f32.vlgmr.msra.gmra.mxu0 %vm68_vm1, %v46_v19 }
 0x121   :  { %v153_v21 = vpop.f32.mrf.mxu0 }
 0x122   :  { %v170_v22 = vadd.f32 %v205_v20, %v153_v21 }
 0x123   :  { %v257_v23 = vpop.f32.mrf.mxu0 }
 0x124   :  { %171 = vst [vmem:[#allocation8] sm:$0xff] %v170_v22 }
 0x125   :  { %316 = shalt.err (!%p313_p0)
}
 0x126   :  { %181 = dma.vmem_to_hbm [thread:$0]  %s179_s26, 128, %s390_s3, [#allocation5]  }
 0x127   :  { %329 = dma.done.wait [#allocation5], 128  }
 0x128   :  { %330 = vsyncadd [#allocation5], 4294967168 }
 0x129   :  { %185 = vsyncpa [#allocation4], 1 }
 0x12a   :  { %186 = vsyncpa [#allocation7], 1 }
 0x12b   :  { %187 = vsyncpa [#allocation5], 1 }

</bundles_post_ra>
